<compile_context>
chip_gen: v7x
topology: tpu7x:2x2x1
jax: 0.10.0
libtpu: 0.0.40
codegen_flags: <defaults>
</compile_context>

<pallas_src>
import numpy as np

import jax
import jax.numpy as jnp
from jax.experimental import pallas as pl
from jax.experimental.pallas import tpu as pltpu

_LANES = 128
_MIN_PALLAS_ROWS = 32  # below 32 slab rows (4096 elems) launch overhead dominates


def _clip_kernel(b_ref, x_ref, o_ref):
    # b_ref: (2, 128) resident bounds; x_ref/o_ref: (tile_rows, 128) slab tile.
    lo = b_ref[0:1, :]   # [0, 0, -inf, -inf] repeated across the 128 lanes
    hi = b_ref[1:2, :]   # [inf, inf, W-1, H-1] repeated across the 128 lanes
    o_ref[...] = jnp.minimum(jnp.maximum(x_ref[...], lo), hi)


def _bounds(width, height, dtype):
    inf = np.inf
    lo = np.tile(np.array([0.0, 0.0, -inf, -inf], dtype=np.float32), _LANES // 4)
    hi = np.tile(np.array([inf, inf, float(width - 1), float(height - 1)],
                          dtype=np.float32), _LANES // 4)
    return jnp.asarray(np.stack([lo, hi]), dtype=dtype)   # (2, 128)


def _round_up(x, m):
    return ((x + m - 1) // m) * m


def _pick_tile_rows(rows, requested):
    """Tile height: multiple of 32 sublanes, never taller than the slab,
    and >= 2 grid steps when there's enough work (feeds both v7x TCs)."""
    tr = max(32, (int(requested) // 32) * 32)
    tr = min(tr, max(32, (rows // 32) * 32))
    if rows >= 64:
        tr = min(tr, _round_up(pl.cdiv(rows, 2), 32))
    return tr


def _clip_boxes_jnp(boxes, width, height):
    # Fused XLA clamp: 1x(read+write), optimal for misaligned / tiny shapes.
    lo = jnp.array([0.0, 0.0, -jnp.inf, -jnp.inf], dtype=boxes.dtype)
    hi = jnp.array([jnp.inf, jnp.inf, width - 1, height - 1], dtype=boxes.dtype)
    return jnp.minimum(jnp.maximum(boxes, lo), hi)


def _clip_boxes_pallas(boxes, width, height, tile_rows, donate_boxes):
    batch, num_boxes, four = boxes.shape
    assert four == 4
    dtype = boxes.dtype
    total = batch * num_boxes * 4
    assert total % _LANES == 0
    rows = total // _LANES

    tr = _pick_tile_rows(rows, tile_rows)
    grid = (pl.cdiv(rows, tr),)           # ragged last block is masked by Pallas

    # Free, contiguous reshape (bitcast) -- no padding copy.
    slab = boxes.reshape(rows, _LANES)
    bounds = _bounds(width, height, dtype)

    out_slab = pl.pallas_call(
        _clip_kernel,
        out_shape=jax.ShapeDtypeStruct((rows, _LANES), dtype),
        grid=grid,
        in_specs=[
            pl.BlockSpec((2, _LANES), lambda i: (0, 0)),     # bounds (resident)
            pl.BlockSpec((tr, _LANES), lambda i: (i, 0)),    # box slab tile
        ],
        out_specs=pl.BlockSpec((tr, _LANES), lambda i: (i, 0)),
        # Only alias when the caller actually donates `boxes` (e.g. jit
        # donate_argnums); otherwise XLA would add a defensive copy.
        input_output_aliases=({1: 0} if donate_boxes else {}),
        cost_estimate=pl.CostEstimate(
            flops=2 * total,
            transcendentals=0,
            bytes_accessed=2 * total * boxes.dtype.itemsize),
        compiler_params=pltpu.CompilerParams(
            dimension_semantics=("parallel",)),
    )(bounds, slab)

    # Free reshape back to [B, N, 4].
    return out_slab.reshape(batch, num_boxes, 4)


def clip_boxes(boxes, img, *, tile_rows=4096, small_fallback_elems=16384,
               donate_boxes=False):
    """boxes: [B, N, 4] float; img: [B, C, H, W]. Returns clipped boxes [B, N, 4]."""
    _, _, height, width = img.shape
    width, height = int(width), int(height)
    batch, num_boxes, four = boxes.shape
    assert four == 4
    total = batch * num_boxes * 4

    aligned = (total % _LANES == 0)
    big_enough = total >= max(int(small_fallback_elems), _MIN_PALLAS_ROWS * _LANES)
    if not (aligned and big_enough):
        # Misaligned or tiny: the fused jnp clamp is already at the HBM roofline
        # (1x read+write); padding/slicing around a Pallas call would only add
        # full-array copies.
        return _clip_boxes_jnp(boxes, width, height)
    return _clip_boxes_pallas(boxes, width, height, tile_rows, donate_boxes)


def _reference(boxes, width, height):
    ref = boxes
    ref = ref.at[:, :, 0].set(jnp.maximum(boxes[:, :, 0], 0.0))
    ref = ref.at[:, :, 1].set(jnp.maximum(boxes[:, :, 1], 0.0))
    ref = ref.at[:, :, 2].set(jnp.minimum(boxes[:, :, 2], width - 1))
    ref = ref.at[:, :, 3].set(jnp.minimum(boxes[:, :, 3], height - 1))
    return ref


if __name__ == "__main__":
    key = jax.random.PRNGKey(0)
    k1, k2, k3, k4, k5 = jax.random.split(key, 5)

    B, C, H, W = 2, 4, 16, 16
    img = jax.random.normal(k2, (B, C, H, W), dtype=jnp.float32)

    # Case 1: aligned (B*N % 32 == 0) -> zero-copy Pallas path, 3 grid steps.
    N1 = 1536                                       # rows = 96, tr = 32 -> grid 3
    boxes1 = jax.random.uniform(k1, (B, N1, 4), jnp.float32, -10.0, 30.0)
    out1 = jax.block_until_ready(
        clip_boxes(boxes1, img, tile_rows=32, small_fallback_elems=0))
    assert out1.shape == boxes1.shape
    assert jnp.allclose(out1, _reference(boxes1, W, H)), "mismatch (aligned)"

    # Case 2: aligned with ragged last block (rows = 97, tr = 32 -> 4 steps,
    # last block is 1 row and is masked by Pallas).
    N2 = 1552
    boxes2 = jax.random.uniform(k3, (B, N2, 4), jnp.float32, -20.0, 40.0)
    out2 = jax.block_until_ready(
        clip_boxes(boxes2, img, tile_rows=32, small_fallback_elems=0))
    assert jnp.allclose(out2, _reference(boxes2, W, H)), "mismatch (ragged)"

    # Case 3: default settings (large tiles, >=2 grid steps) through Pallas.
    N3 = 4096                                       # 32768 elems >= default threshold
    boxes3 = jax.random.uniform(k4, (B, N3, 4), jnp.float32, -20.0, 40.0)
    out3 = jax.block_until_ready(clip_boxes(boxes3, img))
    assert jnp.allclose(out3, _reference(boxes3, W, H)), "mismatch (default)"

    # Case 4: misaligned shape (B*N % 32 != 0) -> fused jnp fallback.
    N4 = 1001
    boxes4 = jax.random.uniform(k5, (B, N4, 4), jnp.float32, -20.0, 40.0)
    out4 = jax.block_until_ready(clip_boxes(boxes4, img))
    assert jnp.allclose(out4, _reference(boxes4, W, H)), "mismatch (fallback)"

    print("KERNEL_OK")
</pallas_src>

<mosaic_0001>
module attributes {stable_mosaic.version = 11 : i64} {
  func.func @_clip_kernel(%arg0: i32, %arg1: memref<2x128xf32, #tpu.memory_space<vmem>>, %arg2: memref<32x128xf32, #tpu.memory_space<vmem>>, %arg3: memref<32x128xf32, #tpu.memory_space<vmem>>) attributes {dimension_semantics = [#tpu.dimension_semantics<parallel>], iteration_bounds = array<i64: 3>, scalar_prefetch = 0 : i64, scratch_operands = 0 : i64, tpu.core_type = #tpu.core_type<tc>, window_params = [{pipeline_mode = #tpu.pipeline_mode<synchronous>, transform_indices = @transform_0, window_bounds = array<i64: 2, 128>}, {transform_indices = @transform_1, window_bounds = array<i64: 32, 128>}, {transform_indices = @transform_2, window_bounds = array<i64: 32, 128>}]} {
    %c0 = arith.constant 0 : index
    %c0_0 = arith.constant 0 : index
    %0 = vector.load %arg1[%c0, %c0_0] : memref<2x128xf32, #tpu.memory_space<vmem>>, vector<1x128xf32>
    %c1 = arith.constant 1 : index
    %c0_1 = arith.constant 0 : index
    %1 = vector.load %arg1[%c1, %c0_1] : memref<2x128xf32, #tpu.memory_space<vmem>>, vector<1x128xf32>
    %c0_2 = arith.constant 0 : index
    %c0_3 = arith.constant 0 : index
    %2 = vector.load %arg2[%c0_2, %c0_3] : memref<32x128xf32, #tpu.memory_space<vmem>>, vector<32x128xf32>
    %3 = vector.broadcast %0 : vector<1x128xf32> to vector<32x128xf32>
    %4 = arith.maximumf %2, %3 : vector<32x128xf32>
    %5 = vector.broadcast %1 : vector<1x128xf32> to vector<32x128xf32>
    %6 = arith.minimumf %4, %5 : vector<32x128xf32>
    %c0_4 = arith.constant 0 : index
    %c0_5 = arith.constant 0 : index
    %7 = vector.load %arg3[%c0_4, %c0_5] : memref<32x128xf32, #tpu.memory_space<vmem>>, vector<32x128xf32>
    tpu.vector_store %arg3[%c0_4, %c0_5], %6 {strides = array<i32>} : memref<32x128xf32, #tpu.memory_space<vmem>>, vector<32x128xf32>,
    return
  }
  func.func @transform_0(%arg0: i32) -> (i32, i32) {
    %c0_i32 = arith.constant 0 : i32
    %c0_i32_0 = arith.constant 0 : i32
    %c0_i32_1 = arith.constant 0 : i32
    return %c0_i32, %c0_i32_0 : i32, i32
  }
  func.func @transform_1(%arg0: i32) -> (i32, i32) {
    %c0_i32 = arith.constant 0 : i32
    %c0_i32_0 = arith.constant 0 : i32
    return %arg0, %c0_i32 : i32, i32
  }
  func.func @transform_2(%arg0: i32) -> (i32, i32) {
    %c0_i32 = arith.constant 0 : i32
    %c0_i32_0 = arith.constant 0 : i32
    return %arg0, %c0_i32 : i32, i32
  }
}

</mosaic_0001>

<bundles_post_ra>
// kernel: tpu_custom_call.1
= control target key start
LH: loop header
LB: loop body
LE: loop exit
PB: predicated region body
PF: predicated region fallthrough
CT: control target
= control target key end

     0   :  { %7 = vsyncpa [#allocation3], 0  ;;  %s731_s0 = inlined_call_operand.hbm [shape: f32[2,128], index: 0, kind: input, shape index: {}]   ;;  %s732_s1 = inlined_call_operand.hbm [shape: f32[96,128], index: 1, kind: input, shape index: {}]   ;;  %s733_s2 = inlined_call_operand.hbm [shape: f32[96,128], index: 2, kind: output, shape index: {}]  }
   0x1   :  { %8 = vsyncpa [#allocation6], 0 }
   0x2   :  { %10 = vsyncpa [#allocation6 + $0x1], 0 }
   0x3   :  { %11 = vsyncpa [#allocation4], 0 }
   0x4   :  { %13 = vsyncpa [#allocation4 + $0x1], 0  ;;  %s535_s9 = smov 0   ;;  %s537_s10 = smov 0  }
   0x5   :  { %s539_s11 = smov 0   ;;  %s541_s12 = smov 0  }
   0x6 LB: > { %s556_s13 = sadd.s32 4294967295, %s511_s12   ;;  %s302_s14 = sadd.s32 4294967294, %s511_s12   ;;  %s511_s12 = sphi %s541_s12, %s756_s12   ;;  %s507_s11 = sphi %s539_s11, %s755_s11   ;;  %s503_s10 = sphi %s537_s10, %s754_s10   ;;  %s499_s9 = sphi %s535_s9, %s753_s9  }
   0x7   : > { %s560_s15 = sadd.s32 1, %s511_s12   ;;  %s47_s16 = sadd.s32 1, %s507_s11 }
   0x8   : > { %s44_s17 = ssub.s32 %s511_s12, %s560_s15  ;;  %p54_p0 = scmp.ne.s32.totalorder %s507_s11, %s503_s10 }
   0x9   : > { %p45_p1 = scmp.eq.s32.totalorder %s44_s17, 0  ;;  %p55_p2 = scmp.eq.s32.totalorder %s511_s12, 0 }
   0xa   : > { %p60_p3 = scmp.ne.s32.totalorder %s503_s10, %s499_s9  ;;  %p734_p4 = scmp.eq.s32.totalorder %s556_s13, 0 }
   0xb   : > { %s572_s18 = scalar_select %p45_p1, %s507_s11, %s47_s16  }
   0xc   : > { %p574_p5 = por %p55_p2, %p54_p0  ;;  %p580_p6 = por %p734_p4, %p60_p3 }
   0xd   : > { %p84_p7 = scmp.eq.s32.totalorder %s556_s13, 2  ;;  %p90_p8 = scmp.eq.s32.totalorder %s302_s14, 2 }
   0xe   : > { %s740_s20 = scalar_select %p580_p6, 1, 0 }
   0xf   : > { %p303_p9 = scmp.ge.s32.totalorder %s511_s12, 1  ;;  %p97_p10 = scmp.lt.s32.totalorder %s511_s12, 4 }
  0x10   : > { %p587_p11 = por %p84_p7, %p54_p0  ;;  %p591_p12 = por %p90_p8, %p60_p3 }
  0x11   : > { %p595_p13 = pnand %p303_p9, %p97_p10  ;;  %s513_s24 = smov [#allocation2]  }
  0x12   : > { %s741_s21 = scalar_select %p587_p11, 1, 0 }
  0x13   : > { %s742_s22 = scalar_select %p591_p12, 1, 0 }
  0x14   : > { %s743_s23 = scalar_select %p595_p13, 1, 0 }
  0x15   : > { %p330_p1 = pneg %p595_p13  ;;  %s110_s25 = sshll.u32 %s513_s24, 4  ;;  %s111_s25 = int_to_ptr.vmem [resolvable:$true] %s110_s25 }
  0x16   : > { %p343_p2 = scmp.lt.s32.totalorder %s511_s12, 3  ;;  %s121_s27 = sand.u32 1, %s507_s11  }
  0x17   : > { %p604_p0 = pnand %p330_p1, %p734_p4  ;;  %s306_s29 = sshll.u32 %s121_s27, 5 }
  0x18   : > { %p611_p3 = pnand %p343_p2, %p574_p5  ;;  %s383_s4 = scalar_lea.hbm %s731_s0, 32 }
  0x19   : > { %p384_p7 = scmp.ne.s32.totalorder %s731_s0, %s383_s4  ;;  %p385_p8 = pneg %p604_p0 }
  0x1a   : > { %s745_s28 = scalar_select %p611_p3, 1, 0 }
  0x1b   : > { %p386_p9 = pnand %p385_p8, %p384_p7  ;;  %p390_p5 = scmp.lt.u32.totalorder %s383_s4, %s731_s0 }
  0x1d   : > { %p387_p10 = pneg %p386_p9 }
  0x1f   : > { %p392_p1 = pnand %p390_p5, %p387_p10 }
  0x21   : > { %395 = shalt.err (!%p392_p1)
}
  0x22   : > { %s396_s14 = scalar_lea.vmem %s111_s25, 32  ;;  %p404_p11 = scmp.lt.s32.totalorder %s111_s25, %s111_s25 }
  0x23   : > { %p397_p2 = scmp.ne.s32.totalorder %s111_s25, %s396_s14  ;;  %p405_p6 = scmp.lt.s32.totalorder %s396_s14, %s396_s14 }
  0x25   : > { %p399_p4 = pnand %p397_p2, %p385_p8  ;;  %p406_p13 = por %p405_p6, %p404_p11 }
  0x27   : > { %p400_p12 = pneg %p399_p4 }
  0x29   : > { %p407_p3 = pnand %p406_p13, %p400_p12 }
  0x2b   : > { %410 = shalt.err (!%p407_p3)
}
  0x2c   : > { %333 = dma.hbm_to_vmem [thread:$0]  (!%p604_p0), %s731_s0, 32, %s111_s25, [#allocation3]  }
  0x2d   : > { %s320_s19 = sshll.u32 %s511_s12, 9  ;;  %s125_s24 = scalar_lea.vmem [#allocation5], %s306_s29 }
  0x2e   : > { %s132_s30 = sshll.u32 %s125_s24, 4  ;;  %s635_s5 = scalar_lea.hbm %s732_s1, %s320_s19  ;;  %s637_s30 = int_to_ptr.vmem [resolvable:$true] %s132_s30 }
  0x2f   : > { %s639_s26 = scalar_lea.sflag [#allocation6], %s121_s27  ;;  %s411_s6 = scalar_lea.hbm %s635_s5, 512 }
  0x30   : > { %p412_p4 = scmp.ne.s32.totalorder %s635_s5, %s411_s6  ;;  %p746_p6 = scmp.ne.s32.totalorder %s745_s28, 0 }
  0x31   : > { %s416_s7 = scalar_lea.hbm %s732_s1, 1536  ;;  %p417_p0 = scmp.lt.u32.totalorder %s635_s5, %s732_s1 }
  0x32   : > { %p413_p11 = pneg %p746_p6  ;;  %p418_p3 = scmp.lt.u32.totalorder %s416_s7, %s411_s6 }
  0x33   : > { %p420_p8 = scmp.lt.u32.totalorder %s411_s6, %s635_s5 }
  0x34   : > { %p414_p12 = pnand %p413_p11, %p412_p4  ;;  %p419_p7 = por %p418_p3, %p417_p0 }
  0x36   : > { %p415_p13 = pneg %p414_p12  ;;  %p421_p9 = por %p420_p8, %p419_p7 }
  0x38   : > { %p422_p10 = pnand %p421_p9, %p415_p13 }
  0x3a   : > { %425 = shalt.err (!%p422_p10)
}
  0x3b   : > { %s426_s27 = scalar_lea.vmem %s637_s30, 512  ;;  %s514_s16 = smov [#allocation5]  }
  0x3c   : > { %p427_p5 = scmp.ne.s32.totalorder %s637_s30, %s426_s27  ;;  %s431_s17 = sshll.u32 %s514_s16, 4  ;;  %s432_s17 = int_to_ptr.vmem [resolvable:$false] %s431_s17 }
  0x3d   : > { %s433_s19 = scalar_lea.vmem %s432_s17, 1024  ;;  %p434_p4 = scmp.lt.s32.totalorder %s637_s30, %s432_s17 }
  0x3e   : > { %p429_p1 = pnand %p427_p5, %p413_p11  ;;  %p435_p12 = scmp.lt.s32.totalorder %s433_s19, %s426_s27 }
  0x40   : > { %p430_p2 = pneg %p429_p1  ;;  %p436_p0 = por %p435_p12, %p434_p4 }
  0x42   : > { %p437_p3 = pnand %p436_p0, %p430_p2 }
  0x44   : > { %440 = shalt.err (!%p437_p3)
}
  0x45   : > { %s515_s24 = smov 128   ;;  %s516_s3 = smov 8  }
  0x46   : > { %337 = dma.hbm_to_vmem [thread:$0]  (!%p746_p6), %s635_s5, 512, %s637_s30, %s639_s26, %s515_s24, %s515_s24, %s516_s3  }
  0x47   : > { %p747_p11 = scmp.ne.s32.totalorder %s743_s23, 0 }
  0x48   : > { %p748_p13 = scmp.eq.s32.totalorder (!%p747_p11), %s556_s13, 0 }
  0x49   : > { %144 = sbr.rel (%p747_p11) target bundleno = 112 (0x70), region = 28 }
  0x50   : > { %486 = dma.done.wait (%p748_p13), [#allocation3], 32   ;;  %p749_p7 = pmov %p748_p13 }
  0x51   : > { %s674_s4 = sand.u32 1, %s503_s10   ;;  %p750_p8 = scmp.ne.s32.totalorder %s740_s20, 0 }
  0x52   : > { %488 = vsyncadd (%p749_p7), [#allocation3], 4294967264  ;;  %s311_s6 = sshll.u32 %s674_s4, 5  ;;  %s151_s25 = scalar_lea.sflag [#allocation6], %s674_s4 }
  0x53   : > { %s154_s29 = scalar_lea.vmem [#allocation5], %s311_s6 }
  0x54   : > { %490 = dma.done.wait (%p750_p8), %s151_s25, 512  }
  0x55   : > { %492 = vsyncadd (%p750_p8), %s151_s25, 4294966784  ;;  %s174_s23 = scalar_lea.vmem [#allocation7], %s311_s6  ;;  %v313_v0 = vld [vmem:[#allocation2] ss:$0 sm:$0xff]  ;;  %v314_v1 = vld [vmem:[#allocation2 + $0x1] ss:$0 sm:$0xff] }
  0x56   : > { %s217_s28 = sshll.u32 %s174_s23, 4  ;;  %v179_v2 = vld [vmem:[%s154_s29] sm:$0xff]  ;;  %s321_s30 = sshll.u32 %s556_s13, 9  ;;  %v180_v4 = vld [vmem:[%s154_s29 + $0x8] sm:$0xff]  ;;  %v181_v5 = vld [vmem:[%s154_s29 + $0x10] sm:$0xff]  ;;  %s683_s28 = int_to_ptr.vmem [resolvable:$true] %s217_s28 }
  0x57   : > { %v187_v3 = vmax.f32 %v179_v2, %v313_v0  ;;  %v182_v6 = vld [vmem:[%s154_s29 + $0x18] sm:$0xff]  ;;  %v188_v7 = vmax.f32 %v180_v4, %v313_v0  ;;  %v189_v8 = vmax.f32 %v181_v5, %v313_v0  ;;  %s688_s26 = scalar_lea.hbm %s733_s2, %s321_s30  ;;  %s204_s13 = scalar_lea.sflag [#allocation4], %s674_s4 }
  0x58   : > { %v190_v9 = vmax.f32 %v182_v6, %v313_v0  ;;  %s441_s7 = scalar_lea.vmem %s683_s28, 512  ;;  %p751_p9 = scmp.ne.s32.totalorder %s741_s21, 0 }
  0x59   : > { %v195_v10 = vmin.f32 %v187_v3, %v314_v1  ;;  %v196_v11 = vmin.f32 %v188_v7, %v314_v1  ;;  %v197_v12 = vmin.f32 %v189_v8, %v314_v1  ;;  %p442_p6 = scmp.ne.s32.totalorder %s683_s28, %s441_s7  ;;  %s517_s8 = smov [#allocation7]  }
  0x5a   : > { %v198_v13 = vmin.f32 %v190_v9, %v314_v1  ;;  %s445_s14 = sshll.u32 %s517_s8, 4  ;;  %s446_s14 = int_to_ptr.vmem [resolvable:$false] %s445_s14 }
  0x5b   : > { %199 = vst [vmem:[%s174_s23] sm:$0xff] %v195_v10  ;;  %200 = vst [vmem:[%s174_s23 + $0x8] sm:$0xff] %v196_v11  ;;  %p443_p10 = pnand %p442_p6, %p751_p9  ;;  %s447_s27 = scalar_lea.vmem %s446_s14, 1024 }
  0x5c   : > { %201 = vst [vmem:[%s174_s23 + $0x10] sm:$0xff] %v197_v12  ;;  %202 = vst [vmem:[%s174_s23 + $0x18] sm:$0xff] %v198_v13  ;;  %p448_p1 = scmp.lt.s32.totalorder %s683_s28, %s446_s14  ;;  %p449_p2 = scmp.lt.s32.totalorder %s447_s27, %s441_s7 }
  0x5d   : > { %p444_p5 = pneg %p443_p10 }
  0x5e   : > { %p450_p4 = por %p449_p2, %p448_p1 }
  0x60   : > { %p451_p12 = pnand %p450_p4, %p444_p5 }
  0x62   : > { %454 = shalt.err (!%p451_p12)
}
  0x63   : > { %s455_s16 = scalar_lea.hbm %s688_s26, 512  ;;  %s459_s24 = scalar_lea.hbm %s733_s2, 1536 }
  0x64   : > { %p456_p0 = scmp.ne.s32.totalorder %s688_s26, %s455_s16  ;;  %p460_p13 = scmp.lt.u32.totalorder %s688_s26, %s733_s2 }
  0x65   : > { %p461_p7 = scmp.lt.u32.totalorder %s459_s24, %s455_s16  ;;  %p463_p6 = scmp.lt.u32.totalorder %s455_s16, %s688_s26 }
  0x66   : > { %p457_p3 = pnand %p456_p0, %p751_p9 }
  0x67   : > { %p462_p8 = por %p461_p7, %p460_p13 }
  0x68   : > { %p458_p11 = pneg %p457_p3 }
  0x69   : > { %p464_p10 = por %p463_p6, %p462_p8 }
  0x6b   : > { %p465_p5 = pnand %p464_p10, %p458_p11 }
  0x6d   : > { %468 = shalt.err (!%p465_p5)
}
  0x6e   : > { %s518_s25 = smov 128   ;;  %s519_s29 = smov 8  }
  0x6f   : > { %328 = dma.vmem_to_hbm [thread:$0]  (%p751_p9), %s683_s28, 512, %s688_s26, %s204_s13, %s518_s25, %s518_s25, %s519_s29  }
  0x70 PF: > { %p345_p1 = scmp.ge.s32.totalorder %s511_s12, 2  ;;  %s232_s23 = sand.u32 1, %s499_s9  }
  0x71   : > { %p752_p2 = scmp.ne.s32.totalorder %s742_s22, 0  ;;  %s233_s30 = scalar_lea.sflag [#allocation4], %s232_s23 }
  0x73   : > { %p339_p4 = pnand %p345_p1, %p752_p2 }
  0x75   : > { %494 = dma.done.wait (!%p339_p4), %s233_s30, 512  }
  0x76   : > { %496 = vsyncadd (!%p339_p4), %s233_s30, 4294966784  ;;  %p16_p12 = scmp.ge.s32.totalorder %s560_s15, 5   ;;  %s753_s9 = smov %s503_s10 }
  0x77   : > { %s754_s10 = smov %s507_s11  ;;  %s755_s11 = smov %s572_s18 }
  0x78   : > { %s756_s12 = smov %s560_s15  ;;  %18 = sbr.rel (!%p16_p12) target bundleno = 6 (0x6), region = 78 }
  0x7f   :  { %238 = vsyncpa [#allocation3], 1 }
  0x80   :  { %240 = vsyncpa [#allocation3 + $0x1], 1 }
  0x81   :  { %241 = vsyncpa [#allocation6], 1 }
  0x82   :  { %243 = vsyncpa [#allocation6 + $0x1], 1 }
  0x83   :  { %244 = vsyncpa [#allocation4], 1 }
  0x84   :  { %246 = vsyncpa [#allocation4 + $0x1], 1 }

</bundles_post_ra>
